<compile_context>
chip_gen: v7x
topology: tpu7x:2x2x1
jax: 0.10.0
libtpu: 0.0.40
codegen_flags: <defaults>
</compile_context>

<pallas_src>
import functools

import numpy as np
import jax
import jax.numpy as jnp
from jax.experimental import pallas as pl
from jax.experimental.pallas import tpu as pltpu


def lattice_adjacency(dim, lattice_dim=2):
    """Adjacency matrix of a periodic (circular) hyper-cubic lattice.

    Deterministic replacement for ig.Graph.Lattice(dim=[dim]*lattice_dim,
    circular=True).get_adjacency().
    """
    D = dim ** lattice_dim
    A = np.zeros((D, D), dtype=np.float32)
    for flat in range(D):
        coords = []
        r = flat
        for _ in range(lattice_dim):
            coords.append(r % dim)
            r //= dim
        for axis in range(lattice_dim):
            for delta in (-1, 1):
                nb = list(coords)
                nb[axis] = (nb[axis] + delta) % dim
                nflat = 0
                for a in reversed(range(lattice_dim)):
                    nflat = nflat * dim + nb[a]
                A[flat, nflat] = 1.0
    return A


def _round_up(n, m):
    return ((n + m - 1) // m) * m


def ising_kernel(x_ref, g_ref, bias_ref, out_ref, *, sigma):
    # x_ref: (TB, D) caller dtype; g_ref: (D, D) bf16 {0,1}; bias_ref: (1, D) f32
    # out_ref: (TB, 1) f32
    xf = x_ref[...].astype(jnp.float32)
    xs = 2.0 * xf - 1.0                          # spins in {-1, +1}, exact in f32
    xb = xs.astype(jnp.bfloat16)                 # exact: values are +-1

    # bf16 x bf16 -> f32-accumulated MXU matmul; results are small exact ints.
    xg = jnp.dot(xb, g_ref[...], preferred_element_type=jnp.float32)

    # Fused epilogue: one VPU FMA pass + a single cross-lane reduction.
    w = (xg * sigma + bias_ref[...]) * xs        # (TB, D)
    out_ref[...] = jnp.sum(w, axis=-1, keepdims=True).astype(out_ref.dtype)


def lattice_ising_forward(x, G, sigma, bias, *, tb=256):
    """Pallas implementation of LatticeIsingModel.forward."""
    B = x.shape[0]
    x2 = x.reshape(B, -1)                        # flatten like x.view(B, -1); no dtype cast
    D = x2.shape[1]

    # Static parameters, prepped once.
    sigma_f = float(np.asarray(jax.device_get(sigma)))  # scalar baked into the kernel
    g_bf16 = jnp.asarray(G, jnp.bfloat16)        # {0,1} adjacency -> exact in bf16
    bias2 = jnp.asarray(bias, jnp.float32).reshape(1, D)

    # Batch tiling: MXU-friendly tile (multiple of 8 sublanes); pad B up to it.
    tb_eff = min(tb, _round_up(B, 8))
    B_pad = _round_up(B, tb_eff)
    if B_pad != B:
        x2 = jnp.pad(x2, ((0, B_pad - B), (0, 0)))

    kernel = functools.partial(ising_kernel, sigma=sigma_f)
    out = pl.pallas_call(
        kernel,
        out_shape=jax.ShapeDtypeStruct((B_pad, 1), jnp.float32),
        grid=(B_pad // tb_eff,),
        in_specs=[
            pl.BlockSpec((tb_eff, D), lambda i: (i, 0)),   # x batch tile
            pl.BlockSpec((D, D), lambda i: (0, 0)),        # G resident (bf16)
            pl.BlockSpec((1, D), lambda i: (0, 0)),        # bias resident
        ],
        out_specs=pl.BlockSpec((tb_eff, 1), lambda i: (i, 0)),
        compiler_params=pltpu.CompilerParams(
            dimension_semantics=("parallel",)),
    )(x2, g_bf16, bias2)
    return out[:B, 0]                            # (B,)


if __name__ == "__main__":
    # Module config: dim=16, lattice_dim=2  ->  data_dim D = 256 (lane-aligned).
    dim = 16
    lattice_dim = 2
    D = dim ** lattice_dim
    B = 64                                       # small demo batch

    init_sigma = 0.15
    init_bias = 0.0

    # Deterministic parameter init (matches __init__ shapes).
    G_np = lattice_adjacency(dim, lattice_dim)                   # (D, D)
    sigma = jnp.float32(init_sigma)                              # scalar
    bias = jnp.ones((D,), jnp.float32) * init_bias               # (D,)

    # Deterministic example input: Bernoulli(0.5) samples in {0,1},
    # given as (B, dim, dim) to exercise the flattening path.
    key = jax.random.PRNGKey(0)
    x = jax.random.bernoulli(key, 0.5, (B, dim, dim)).astype(jnp.float32)

    out = lattice_ising_forward(x, jnp.asarray(G_np), sigma, bias)
    out = jax.block_until_ready(out)

    # Host float64 reference of the forward semantics (avoids TPU default
    # matmul precision contaminating the check).
    sig = float(np.float32(init_sigma))
    x2 = np.asarray(x, np.float64).reshape(B, -1)
    xm = 2.0 * x2 - 1.0
    J = G_np.astype(np.float64) * sig
    ref = (xm @ J * xm).sum(-1) + (np.asarray(bias, np.float64)[None, :] * xm).sum(-1)

    assert out.shape == (B,)
    assert np.allclose(np.asarray(out, np.float64), ref, rtol=1e-5, atol=1e-3), (out, ref)

    print("KERNEL_OK")
</pallas_src>

<mosaic_0001>
module attributes {stable_mosaic.version = 11 : i64} {
  func.func @ising_kernel(%arg0: i32, %arg1: memref<64x256xf32, #tpu.memory_space<vmem>>, %arg2: memref<256x256xbf16, #tpu.memory_space<vmem>>, %arg3: memref<1x256xf32, #tpu.memory_space<vmem>>, %arg4: memref<64x1xf32, #tpu.memory_space<vmem>>) attributes {dimension_semantics = [#tpu.dimension_semantics<parallel>], iteration_bounds = array<i64: 1>, scalar_prefetch = 0 : i64, scratch_operands = 0 : i64, tpu.core_type = #tpu.core_type<tc>, window_params = [{transform_indices = @transform_0, window_bounds = array<i64: 64, 256>}, {pipeline_mode = #tpu.pipeline_mode<synchronous>, transform_indices = @transform_1, window_bounds = array<i64: 256, 256>}, {pipeline_mode = #tpu.pipeline_mode<synchronous>, transform_indices = @transform_2, window_bounds = array<i64: 1, 256>}, {transform_indices = @transform_3, window_bounds = array<i64: 64, 1>}]} {
    %c0 = arith.constant 0 : index
    %c0_0 = arith.constant 0 : index
    %0 = vector.load %arg1[%c0, %c0_0] : memref<64x256xf32, #tpu.memory_space<vmem>>, vector<64x256xf32>
    %cst = arith.constant 2.000000e+00 : f32
    %1 = vector.broadcast %cst : f32 to vector<64x256xf32>
    %2 = arith.mulf %1, %0 : vector<64x256xf32>
    %cst_1 = arith.constant 1.000000e+00 : f32
    %3 = vector.broadcast %cst_1 : f32 to vector<64x256xf32>
    %4 = arith.subf %2, %3 : vector<64x256xf32>
    %5 = arith.truncf %4 : vector<64x256xf32> to vector<64x256xbf16>
    %c0_2 = arith.constant 0 : index
    %c0_3 = arith.constant 0 : index
    %6 = vector.load %arg2[%c0_2, %c0_3] : memref<256x256xbf16, #tpu.memory_space<vmem>>, vector<256x256xbf16>
    %cst_4 = arith.constant dense<0.000000e+00> : vector<64x256xf32>
    %7 = tpu.matmul %5, %6, %cst_4 {dimension_numbers = #tpu.dot_dimension_numbers<[1], [0], [0], [1], [0, 0, 1, 1], [], []>} : vector<64x256xbf16>, vector<256x256xbf16>, vector<64x256xf32> -> vector<64x256xf32>
    %cst_5 = arith.constant 1.500000e-01 : f32
    %8 = vector.broadcast %cst_5 : f32 to vector<64x256xf32>
    %9 = arith.mulf %7, %8 : vector<64x256xf32>
    %c0_6 = arith.constant 0 : index
    %c0_7 = arith.constant 0 : index
    %10 = vector.load %arg3[%c0_6, %c0_7] : memref<1x256xf32, #tpu.memory_space<vmem>>, vector<1x256xf32>
    %11 = vector.broadcast %10 : vector<1x256xf32> to vector<64x256xf32>
    %12 = arith.addf %9, %11 : vector<64x256xf32>
    %13 = arith.mulf %12, %4 : vector<64x256xf32>
    %cst_8 = arith.constant dense<0.000000e+00> : vector<64xf32>
    %14 = vector.multi_reduction <add>, %13, %cst_8 [1] : vector<64x256xf32> to vector<64xf32>
    %15 = vector.shape_cast %14 : vector<64xf32> to vector<64x1xf32>
    %c0_9 = arith.constant 0 : index
    %c0_10 = arith.constant 0 : index
    %16 = vector.load %arg4[%c0_9, %c0_10] : memref<64x1xf32, #tpu.memory_space<vmem>>, vector<64x1xf32>
    tpu.vector_store %arg4[%c0_9, %c0_10], %15 {strides = array<i32>} : memref<64x1xf32, #tpu.memory_space<vmem>>, vector<64x1xf32>,
    return
  }
  func.func @transform_0(%arg0: i32) -> (i32, i32) {
    %c0_i32 = arith.constant 0 : i32
    %c0_i32_0 = arith.constant 0 : i32
    return %arg0, %c0_i32 : i32, i32
  }
  func.func @transform_1(%arg0: i32) -> (i32, i32) {
    %c0_i32 = arith.constant 0 : i32
    %c0_i32_0 = arith.constant 0 : i32
    %c0_i32_1 = arith.constant 0 : i32
    return %c0_i32, %c0_i32_0 : i32, i32
  }
  func.func @transform_2(%arg0: i32) -> (i32, i32) {
    %c0_i32 = arith.constant 0 : i32
    %c0_i32_0 = arith.constant 0 : i32
    %c0_i32_1 = arith.constant 0 : i32
    return %c0_i32, %c0_i32_0 : i32, i32
  }
  func.func @transform_3(%arg0: i32) -> (i32, i32) {
    %c0_i32 = arith.constant 0 : i32
    %c0_i32_0 = arith.constant 0 : i32
    return %arg0, %c0_i32 : i32, i32
  }
}

</mosaic_0001>

<bundles_post_ra>
// kernel: tpu_custom_call.1
= control target key start
LH: loop header
LB: loop body
LE: loop exit
PB: predicated region body
PF: predicated region fallthrough
CT: control target
= control target key end

     0   :  { %8 = vsyncpa [#allocation3], 0  ;;  %s793_s0 = inlined_call_operand.hbm [shape: f32[64,256], index: 0, kind: input, shape index: {}]   ;;  %s794_s1 = inlined_call_operand.hbm [shape: bf16[256,256], index: 1, kind: input, shape index: {}]   ;;  %s795_s2 = inlined_call_operand.vmem [shape: f32[1,256], index: 2, kind: input, shape index: {}]   ;;  %s796_s3 = inlined_call_operand.vmem [shape: f32[64,1], index: 3, kind: output, shape index: {}]  }
   0x1   :  { %9 = vsyncpa [#allocation5], 0  ;;  %s644_s12 = smov [#allocation2]   ;;  %s596_s16 = scalar_lea.hbm %s793_s0, 2048 }
   0x2   :  { %s15_s13 = sshll.u32 %s644_s12, 4  ;;  %p597_p0 = scmp.ne.s32.totalorder %s793_s0, %s596_s16  ;;  %s16_s13 = int_to_ptr.vmem [resolvable:$true] %s15_s13 }
   0x3   :  { %p600_p1 = scmp.lt.u32.totalorder %s596_s16, %s793_s0 }
   0x5   :  { %p602_p2 = pnand %p600_p1, %p597_p0 }
   0x7   :  { %605 = shalt.err (!%p602_p2)
}
   0x8   :  { %s606_s21 = scalar_lea.vmem %s16_s13, 2048  ;;  %p611_p4 = scmp.lt.s32.totalorder %s16_s13, %s16_s13 }
   0x9   :  { %p607_p3 = scmp.ne.s32.totalorder %s16_s13, %s606_s21  ;;  %p612_p5 = scmp.lt.s32.totalorder %s606_s21, %s606_s21 }
   0xb   :  { %p613_p6 = por %p612_p5, %p611_p4 }
   0xd   :  { %p614_p7 = pnand %p613_p6, %p607_p3 }
   0xf   :  { %617 = shalt.err (!%p614_p7)
}
  0x10   :  { %s645_s22 = smov 256   ;;  %s646_s23 = smov 16  }
  0x11   :  { %21 = dma.hbm_to_vmem [thread:$0]  %s793_s0, 2048, %s16_s13, [#allocation3], %s645_s22, %s645_s22, %s646_s23  }
  0x12   :  { %s647_s26 = smov [#allocation4]   ;;  %s618_s30 = scalar_lea.hbm %s794_s1, 4096 }
  0x13   :  { %s27_s27 = sshll.u32 %s647_s26, 4  ;;  %p619_p8 = scmp.ne.s32.totalorder %s794_s1, %s618_s30  ;;  %s28_s27 = int_to_ptr.vmem [resolvable:$true] %s27_s27 }
  0x14   :  { %p622_p9 = scmp.lt.u32.totalorder %s618_s30, %s794_s1 }
  0x16   :  { %p624_p10 = pnand %p622_p9, %p619_p8 }
  0x18   :  { %627 = shalt.err (!%p624_p10)
}
  0x19   :  { %s628_s8 = scalar_lea.vmem %s28_s27, 4096  ;;  %p633_p12 = scmp.lt.s32.totalorder %s28_s27, %s28_s27 }
  0x1a   :  { %p629_p11 = scmp.ne.s32.totalorder %s28_s27, %s628_s8  ;;  %p634_p13 = scmp.lt.s32.totalorder %s628_s8, %s628_s8 }
  0x1c   :  { %p635_p0 = por %p634_p13, %p633_p12 }
  0x1e   :  { %p636_p1 = pnand %p635_p0, %p629_p11 }
  0x20   :  { %639 = shalt.err (!%p636_p1)
}
  0x21   :  { %s648_s0 = smov 128   ;;  %s649_s9 = smov 8  }
  0x22   :  { %33 = dma.hbm_to_vmem [thread:$0]  %s794_s1, 4096, %s28_s27, [#allocation5], %s648_s0, %s648_s0, %s649_s9  }
  0x23   :  { %640 = dma.done.wait [#allocation3], 2048  }
  0x24   :  { %641 = vsyncadd [#allocation3], 4294965248 }
  0x25   :  { %642 = dma.done.wait [#allocation5], 4096  }
  0x26   :  { %643 = vsyncadd [#allocation5], 4294963200  ;;  %v548_v0 = vld [vmem:[#allocation4 + $0x4] ss:$8 sps:$4 sm:$0xff]   ;;  %v550_v1 = vld [vmem:[#allocation4] ss:$8 sps:$4 sm:$0xff]  }
  0x27   :  { %290 = vmatprep.subr.bf16.mxu0 %v548_v0  ;;  %510 = vmatprep.subr.bf16.mxu1 %v548_v0  ;;  %v551_v2 = vld [vmem:[#allocation4 + $0x14] ss:$8 sps:$4 sm:$0xff]   ;;  %v553_v3 = vld [vmem:[#allocation4 + $0x10] ss:$8 sps:$4 sm:$0xff]   ;;  %v554_v4 = vld [vmem:[#allocation4 + $0x24] ss:$8 sps:$4 sm:$0xff]  }
  0x28   :  { %291 = vmatpush1.bf16.msra.mxu0 %v550_v1  ;;  %526 = vmatpush1.bf16.msra.mxu1 %v550_v1  ;;  %v556_v5 = vld [vmem:[#allocation4 + $0x20] ss:$8 sps:$4 sm:$0xff]   ;;  %v557_v6 = vld [vmem:[#allocation4 + $0x34] ss:$8 sps:$4 sm:$0xff]   ;;  %v559_v7 = vld [vmem:[#allocation4 + $0x30] ss:$8 sps:$4 sm:$0xff]  }
  0x29   :  { %292 = vmatprep.subr.bf16.mxu0 %v551_v2  ;;  %511 = vmatprep.subr.bf16.mxu1 %v551_v2  ;;  %v560_v8 = vld [vmem:[#allocation4 + $0x44] ss:$8 sps:$4 sm:$0xff]   ;;  %v562_v9 = vld [vmem:[#allocation4 + $0x40] ss:$8 sps:$4 sm:$0xff]   ;;  %v563_v10 = vld [vmem:[#allocation4 + $0x54] ss:$8 sps:$4 sm:$0xff]  }
  0x2a   :  { %v565_v11 = vld [vmem:[#allocation4 + $0x50] ss:$8 sps:$4 sm:$0xff]   ;;  %v566_v12 = vld [vmem:[#allocation4 + $0x64] ss:$8 sps:$4 sm:$0xff]   ;;  %v568_v19 = vld [vmem:[#allocation4 + $0x60] ss:$8 sps:$4 sm:$0xff]  }
  0x2b   :  { %v43_v13 = vld [vmem:[#allocation2 + $0x8] sm:$0xff]  ;;  %v45_v14 = vld [vmem:[#allocation2 + $0x18] sm:$0xff]  ;;  %v42_v43 = vld [vmem:[#allocation2] sm:$0xff]  ;;  %vm447_vm0 = vcmask 7168  }
  0x2c   :  { %293 = vmatpush1.bf16.msra.mxu0 %v553_v3  ;;  %527 = vmatpush1.bf16.msra.mxu1 %v553_v3  ;;  %v59_v15 = vmul.f32 2.0, %v43_v13  ;;  %v61_v16 = vmul.f32 2.0, %v45_v14  ;;  %v51_v17 = vld [vmem:[#allocation2 + $0x48] sm:$0xff]  ;;  %v53_v18 = vld [vmem:[#allocation2 + $0x58] sm:$0xff]  ;;  %v44_v44 = vld [vmem:[#allocation2 + $0x10] sm:$0xff]  ;;  %v58_v51 = vmul.f32 2.0, %v42_v43 }
  0x2d   :  { %294 = vmatprep.subr.bf16.mxu0 %v554_v4  ;;  %512 = vmatprep.subr.bf16.mxu1 %v554_v4  ;;  %v67_v20 = vmul.f32 2.0, %v51_v17  ;;  %v69_v21 = vmul.f32 2.0, %v53_v18  ;;  %v569_v22 = vld [vmem:[#allocation4 + $0x74] ss:$8 sps:$4 sm:$0xff]   ;;  %v571_v28 = vld [vmem:[#allocation4 + $0x70] ss:$8 sps:$4 sm:$0xff]  }
  0x2e   :  { %v694_v23 = vadd.f32 -1.0, %v59_v15  ;;  %v696_v24 = vadd.f32 -1.0, %v61_v16  ;;  %v572_v30 = vld [vmem:[#allocation4 + $0x84] ss:$8 sps:$4 sm:$0xff]   ;;  %v574_v31 = vld [vmem:[#allocation4 + $0x80] ss:$8 sps:$4 sm:$0xff]  }
  0x2f   :  { %v698_v25 = vadd.f32 -1.0, %v67_v20  ;;  %v700_v26 = vadd.f32 -1.0, %v69_v21  ;;  %v575_v32 = vld [vmem:[#allocation4 + $0x94] ss:$8 sps:$4 sm:$0xff]   ;;  %v577_v33 = vld [vmem:[#allocation4 + $0x90] ss:$8 sps:$4 sm:$0xff]  }
  0x30   :  { %295 = vmatpush1.bf16.msra.mxu0 %v556_v5  ;;  %528 = vmatpush1.bf16.msra.mxu1 %v556_v5  ;;  %v91_v27 = vpack.c.bf16 %v696_v24, %v694_v23  ;;  %v578_v34 = vld [vmem:[#allocation4 + $0xa4] ss:$8 sps:$4 sm:$0xff]   ;;  %v580_v35 = vld [vmem:[#allocation4 + $0xa0] ss:$8 sps:$4 sm:$0xff]   ;;  %v581_v36 = vld [vmem:[#allocation4 + $0xb4] ss:$8 sps:$4 sm:$0xff]  }
  0x31   :  { %296 = vmatprep.subr.bf16.mxu0 %v557_v6  ;;  %513 = vmatprep.subr.bf16.mxu1 %v557_v6  ;;  %v95_v29 = vpack.c.bf16 %v700_v26, %v698_v25  ;;  %v583_v37 = vld [vmem:[#allocation4 + $0xb0] ss:$8 sps:$4 sm:$0xff]   ;;  %v584_v38 = vld [vmem:[#allocation4 + $0xc4] ss:$8 sps:$4 sm:$0xff]   ;;  %v586_v39 = vld [vmem:[#allocation4 + $0xc0] ss:$8 sps:$4 sm:$0xff]  }
  0x32   :  { %322 = vmatprep.mubr.bf16.mxu0 %v91_v27  ;;  %v587_v40 = vld [vmem:[#allocation4 + $0xd4] ss:$8 sps:$4 sm:$0xff]   ;;  %v589_v41 = vld [vmem:[#allocation4 + $0xd0] ss:$8 sps:$4 sm:$0xff]   ;;  %v590_v42 = vld [vmem:[#allocation4 + $0xe4] ss:$8 sps:$4 sm:$0xff]  }
  0x33   :  { %342 = vmatprep.mubr.bf16.mxu1 %v95_v29  ;;  %v50_v45 = vld [vmem:[#allocation2 + $0x40] sm:$0xff]  ;;  %v52_v46 = vld [vmem:[#allocation2 + $0x50] sm:$0xff]  ;;  %v47_v47 = vld [vmem:[#allocation2 + $0x28] sm:$0xff]  ;;  %v60_v52 = vmul.f32 2.0, %v44_v44  ;;  %v706_v61 = vadd.f32 -1.0, %v58_v51 }
  0x34   :  { %297 = vmatpush1.bf16.msra.mxu0 %v559_v7  ;;  %529 = vmatpush1.bf16.msra.mxu1 %v559_v7  ;;  %v49_v48 = vld [vmem:[#allocation2 + $0x38] sm:$0xff]  ;;  %v55_v49 = vld [vmem:[#allocation2 + $0x68] sm:$0xff]  ;;  %v66_v53 = vmul.f32 2.0, %v50_v45  ;;  %v68_v54 = vmul.f32 2.0, %v52_v46  ;;  %v63_v56 = vmul.f32 2.0, %v47_v47  ;;  %v46_v2 = vld [vmem:[#allocation2 + $0x20] sm:$0xff] }
  0x35   :  { %298 = vmatprep.subr.bf16.mxu0 %v560_v8  ;;  %514 = vmatprep.subr.bf16.mxu1 %v560_v8  ;;  %v57_v50 = vld [vmem:[#allocation2 + $0x78] sm:$0xff]  ;;  %v592_v55 = vld [vmem:[#allocation4 + $0xe0] ss:$8 sps:$4 sm:$0xff]   ;;  %v65_v57 = vmul.f32 2.0, %v49_v48  ;;  %v71_v58 = vmul.f32 2.0, %v55_v49  ;;  %v708_v62 = vadd.f32 -1.0, %v60_v52 }
  0x36   :  { %v73_v59 = vmul.f32 2.0, %v57_v50  ;;  %v593_v60 = vld [vmem:[#allocation4 + $0xf4] ss:$8 sps:$4 sm:$0xff]   ;;  %v595_v63 = vld [vmem:[#allocation4 + $0xf0] ss:$8 sps:$4 sm:$0xff]   ;;  %v710_v0 = vadd.f32 -1.0, %v66_v53 }
  0x37   :  { %v712_v1 = vadd.f32 -1.0, %v68_v54  ;;  %v48_v3 = vld [vmem:[#allocation2 + $0x30] sm:$0xff]  ;;  %v714_v4 = vadd.f32 -1.0, %v63_v56  ;;  %v716_v5 = vadd.f32 -1.0, %v65_v57  ;;  %v718_v6 = vadd.f32 -1.0, %v71_v58  ;;  %v54_v8 = vld [vmem:[#allocation2 + $0x60] sm:$0xff] }
  0x38   :  { %299 = vmatpush1.bf16.msra.mxu0 %v562_v9  ;;  %530 = vmatpush1.bf16.msra.mxu1 %v562_v9  ;;  %v720_v7 = vadd.f32 -1.0, %v73_v59  ;;  %v56_v9 = vld [vmem:[#allocation2 + $0x70] sm:$0xff]  ;;  %v64_v13 = vmul.f32 2.0, %v48_v3  ;;  %v70_v14 = vmul.f32 2.0, %v54_v8 }
  0x39   :  { %300 = vmatprep.subr.bf16.mxu0 %v563_v10  ;;  %515 = vmatprep.subr.bf16.mxu1 %v563_v10  ;;  %v90_v10 = vpack.c.bf16 %v708_v62, %v706_v61  ;;  %v72_v15 = vmul.f32 2.0, %v56_v9  ;;  %v93_v16 = vpack.c.bf16 %v716_v5, %v714_v4 }
  0x3a   :  { %v97_v17 = vpack.c.bf16 %v720_v7, %v718_v6  ;;  %v734_v20 = vadd.f32 -1.0, %v70_v14 }
  0x3b   :  { %v736_v21 = vadd.f32 -1.0, %v72_v15 }
  0x3c   :  { %301 = vmatpush1.bf16.msra.mxu0 %v565_v11  ;;  %531 = vmatpush1.bf16.msra.mxu1 %v565_v11  ;;  %v62_v11 = vmul.f32 2.0, %v46_v2 }
  0x3d   :  { %302 = vmatprep.subr.bf16.mxu0 %v566_v12  ;;  %516 = vmatprep.subr.bf16.mxu1 %v566_v12  ;;  %v94_v12 = vpack.c.bf16 %v712_v1, %v710_v0  ;;  %v96_v27 = vpack.c.bf16 %v736_v21, %v734_v20 }
  0x3e   :  { %v730_v18 = vadd.f32 -1.0, %v62_v11 }
  0x40   :  { %303 = vmatpush1.bf16.msra.mxu0 %v568_v19  ;;  %532 = vmatpush1.bf16.msra.mxu1 %v568_v19  ;;  %v732_v19 = vadd.f32 -1.0, %v64_v13 }
  0x41   :  { %304 = vmatprep.subr.bf16.mxu0 %v569_v22  ;;  %517 = vmatprep.subr.bf16.mxu1 %v569_v22 }
  0x42   :  { %v92_v22 = vpack.c.bf16 %v732_v19, %v730_v18 }
  0x44   :  { %305 = vmatpush1.bf16.msra.mxu0 %v571_v28  ;;  %533 = vmatpush1.bf16.msra.mxu1 %v571_v28  ;;  %v381_v28 = vlaneseq }
  0x45   :  { %306 = vmatprep.subr.bf16.mxu0 %v572_v30  ;;  %518 = vmatprep.subr.bf16.mxu1 %v572_v30 }
  0x46   :  { %v382_v29 = vshrl.u32 %v381_v28, 7 }
  0x48   :  { %307 = vmatpush1.bf16.msra.mxu0 %v574_v31  ;;  %534 = vmatpush1.bf16.msra.mxu1 %v574_v31  ;;  %v383_v30 = vsub.s32 0, %v382_v29  ;;  %v379_v31 = vld [vmem:[%s795_s2] sm:$0x3] }
  0x49   :  { %308 = vmatprep.subr.bf16.mxu0 %v575_v32  ;;  %519 = vmatprep.subr.bf16.mxu1 %v575_v32  ;;  %v387_v32 = vsub.s32 1, %v382_v29 }
  0x4c   :  { %309 = vmatpush1.bf16.msra.mxu0 %v577_v33  ;;  %535 = vmatpush1.bf16.msra.mxu1 %v577_v33  ;;  %v384_v33 = vrot.slane %v379_v31, %v383_v30 }
  0x4d   :  { %310 = vmatprep.subr.bf16.mxu0 %v578_v34  ;;  %520 = vmatprep.subr.bf16.mxu1 %v578_v34 }
  0x50   :  { %311 = vmatpush1.bf16.msra.mxu0 %v580_v35  ;;  %536 = vmatpush1.bf16.msra.mxu1 %v580_v35 }
  0x51   :  { %312 = vmatprep.subr.bf16.mxu0 %v581_v36  ;;  %521 = vmatprep.subr.bf16.mxu1 %v581_v36  ;;  %v388_v36 = vrot.slane %v379_v31, %v387_v32 }
  0x54   :  { %313 = vmatpush1.bf16.msra.mxu0 %v583_v37  ;;  %537 = vmatpush1.bf16.msra.mxu1 %v583_v37 }
  0x55   :  { %314 = vmatprep.subr.bf16.mxu0 %v584_v38  ;;  %522 = vmatprep.subr.bf16.mxu1 %v584_v38 }
  0x58   :  { %315 = vmatpush1.bf16.msra.mxu0 %v586_v39  ;;  %538 = vmatpush1.bf16.msra.mxu1 %v586_v39 }
  0x59   :  { %316 = vmatprep.subr.bf16.mxu0 %v587_v40  ;;  %523 = vmatprep.subr.bf16.mxu1 %v587_v40 }
  0x5c   :  { %317 = vmatpush1.bf16.msra.mxu0 %v589_v41  ;;  %539 = vmatpush1.bf16.msra.mxu1 %v589_v41 }
  0x5d   :  { %318 = vmatprep.subr.bf16.mxu0 %v590_v42  ;;  %524 = vmatprep.subr.bf16.mxu1 %v590_v42 }
  0x60   :  { %319 = vmatpush1.bf16.msra.mxu0 %v592_v55  ;;  %540 = vmatpush1.bf16.msra.mxu1 %v592_v55 }
  0x61   :  { %320 = vmatprep.subr.bf16.mxu0 %v593_v60  ;;  %525 = vmatprep.subr.bf16.mxu1 %v593_v60 }
  0x64   :  { %321 = vmatpush1.bf16.msra.mxu0 %v595_v63  ;;  %541 = vmatpush1.bf16.msra.mxu1 %v595_v63 }
  0x67   :  { %323 = vmatmul.mubr.bf16.vlgmr.msra.gmra.mrb[0].mxu0 %v90_v10  ;;  %343 = vmatmul.mubr.bf16.vlgmr.msra.gmra.mrb[0].mxu1 %v94_v12 }
  0x68   :  { %332 = vmatprep.mubr.bf16.mxu0 %v93_v16  ;;  %352 = vmatprep.mubr.bf16.mxu1 %v97_v17 }
  0x6f   :  { %333 = vmatmul.mubr.bf16.gmra.mrb[4].mxu0 %v92_v22  ;;  %353 = vmatmul.mubr.bf16.gmra.mrb[4].mxu1 %v96_v27 }
 0x13a   :  { %v324_v34 = vpop.f32.mrb[0].mxu0  ;;  %v344_v35 = vpop.f32.mrb[0].mxu1 }
 0x13b   :  { %v363_v37 = vmul.f32 0.15, %v324_v34  ;;  %v371_v38 = vmul.f32 0.15, %v344_v35  ;;  %v326_v39 = vpop.f32.mrb[1].mxu0  ;;  %v346_v40 = vpop.f32.mrb[1].mxu1 }
 0x13c   :  { %v364_v41 = vmul.f32 0.15, %v326_v39  ;;  %v372_v42 = vmul.f32 0.15, %v346_v40  ;;  %v328_v43 = vpop.f32.mrb[2].mxu0  ;;  %v348_v44 = vpop.f32.mrb[2].mxu1 }
 0x13d   :  { %v391_v45 = vadd.f32 %v384_v33, %v363_v37  ;;  %v399_v46 = vadd.f32 %v384_v33, %v371_v38  ;;  %v365_v47 = vmul.f32 0.15, %v328_v43  ;;  %v373_v48 = vmul.f32 0.15, %v348_v44  ;;  %v330_v49 = vpop.f32.mrb[3].mxu0  ;;  %v350_v50 = vpop.f32.mrb[3].mxu1 }
 0x13e   :  { %v392_v51 = vadd.f32 %v388_v36, %v364_v41  ;;  %v400_v52 = vadd.f32 %v388_v36, %v372_v42  ;;  %v366_v53 = vmul.f32 0.15, %v330_v49  ;;  %v374_v54 = vmul.f32 0.15, %v350_v50 }
 0x13f   :  { %v393_v55 = vadd.f32 %v384_v33, %v365_v47  ;;  %v401_v56 = vadd.f32 %v384_v33, %v373_v48  ;;  %v407_v57 = vmul.f32 %v706_v61, %v391_v45  ;;  %v415_v58 = vmul.f32 %v710_v0, %v399_v46 }
 0x140   :  { %v394_v59 = vadd.f32 %v388_v36, %v366_v53  ;;  %v402_v60 = vadd.f32 %v388_v36, %v374_v54  ;;  %v408_v63 = vmul.f32 %v694_v23, %v392_v51  ;;  %v416_v2 = vmul.f32 %v698_v25, %v400_v52 }
 0x141   :  { %v417_v3 = vmul.f32 %v712_v1, %v401_v56  ;;  %v409_v8 = vmul.f32 %v708_v62, %v393_v55 }
 0x142   :  { %v334_v9 = vpop.f32.mrb[4].mxu0  ;;  %v423_v10 = vadd.f32 %v408_v63, %v407_v57  ;;  %v354_v11 = vpop.f32.mrb[4].mxu1  ;;  %v418_v12 = vmul.f32 %v700_v26, %v402_v60  ;;  %v435_v13 = vadd.f32 %v416_v2, %v415_v58  ;;  %v410_v61 = vmul.f32 %v696_v24, %v394_v59 }
 0x143   :  { %v367_v14 = vmul.f32 0.15, %v334_v9  ;;  %v336_v0 = vpop.f32.mrb[5].mxu0  ;;  %v375_v15 = vmul.f32 0.15, %v354_v11  ;;  %v356_v16 = vpop.f32.mrb[5].mxu1 }
 0x144   :  { %v368_v17 = vmul.f32 0.15, %v336_v0  ;;  %424 = vadd.xlane.f32.xlu0 %v423_v10  ;;  %v338_v23 = vpop.f32.mrb[6].mxu0  ;;  %v438_v25 = vadd.f32 %v418_v12, %v417_v3  ;;  %v376_v22 = vmul.f32 0.15, %v356_v16  ;;  %v358_v1 = vpop.f32.mrb[6].mxu1  ;;  %v426_v27 = vadd.f32 %v410_v61, %v409_v8 }
 0x145   :  { %v395_v62 = vadd.f32 %v384_v33, %v367_v14  ;;  %v369_v28 = vmul.f32 0.15, %v338_v23  ;;  %v340_v29 = vpop.f32.mrb[7].mxu0  ;;  %v403_v30 = vadd.f32 %v384_v33, %v375_v15  ;;  %v377_v31 = vmul.f32 0.15, %v358_v1  ;;  %v360_v26 = vpop.f32.mrb[7].mxu1 }
 0x146   :  { %v396_v32 = vadd.f32 %v388_v36, %v368_v17  ;;  %v370_v34 = vmul.f32 0.15, %v340_v29  ;;  %439 = vadd.xlane.f32.xlu1 %v438_v25  ;;  %v404_v24 = vadd.f32 %v388_v36, %v376_v22  ;;  %v378_v35 = vmul.f32 0.15, %v360_v26 }
 0x147   :  { %v397_v37 = vadd.f32 %v384_v33, %v369_v28  ;;  %v405_v38 = vadd.f32 %v384_v33, %v377_v31  ;;  %v411_v39 = vmul.f32 %v730_v18, %v395_v62  ;;  %v419_v40 = vmul.f32 %v734_v20, %v403_v30 }
 0x148   :  { %v398_v41 = vadd.f32 %v388_v36, %v370_v34  ;;  %v406_v42 = vadd.f32 %v388_v36, %v378_v35  ;;  %436 = vadd.xlane.f32.xlu0 %v435_v13  ;;  %v412_v43 = vmul.f32 %v714_v4, %v396_v32  ;;  %v420_v44 = vmul.f32 %v718_v6, %v404_v24 }
 0x149   :  { %v413_v45 = vmul.f32 %v732_v19, %v397_v37  ;;  %v421_v46 = vmul.f32 %v736_v21, %v405_v38 }
 0x14a   :  { %v429_v47 = vadd.f32 %v412_v43, %v411_v39  ;;  %v414_v48 = vmul.f32 %v716_v5, %v398_v41  ;;  %v441_v49 = vadd.f32 %v420_v44, %v419_v40  ;;  %v422_v33 = vmul.f32 %v720_v7, %v406_v42 }
 0x14c   :  { %427 = vadd.xlane.f32.xlu0 %v426_v27  ;;  %430 = vadd.xlane.f32.xlu1 %v429_v47  ;;  %v432_v18 = vadd.f32 %v414_v48, %v413_v45  ;;  %v444_v20 = vadd.f32 %v422_v33, %v421_v46 }
 0x150   :  { %433 = vadd.xlane.f32.xlu1 %v432_v18  ;;  %442 = vadd.xlane.f32.xlu0 %v441_v49 }
 0x154   :  { %445 = vadd.xlane.f32.xlu1 %v444_v20 }
 0x1d1   :  { %v425_v4 = vpop.xlane.xlu0 %424 }
 0x1d2   :  { %448 = vst.msk [vmem:[%s796_s3] sm:$0xff] %vm447_vm0, %v425_v4 }
 0x1d3   :  { %v440_v6 = vpop.xlane.xlu1 %439 }
 0x1d4   :  { %453 = vst.msk [vmem:[%s796_s3 + $0x28] sm:$0xff] %vm447_vm0, %v440_v6 }
 0x1d5   :  { %v437_v5 = vpop.xlane.xlu0 %436 }
 0x1d6   :  { %452 = vst.msk [vmem:[%s796_s3 + $0x20] sm:$0xff] %vm447_vm0, %v437_v5 }
 0x1d9   :  { %v428_v7 = vpop.xlane.xlu0 %427  ;;  %v431_v19 = vpop.xlane.xlu1 %430 }
 0x1da   :  { %449 = vst.msk [vmem:[%s796_s3 + $0x8] sm:$0xff] %vm447_vm0, %v428_v7  ;;  %450 = vst.msk [vmem:[%s796_s3 + $0x10] sm:$0xff] %vm447_vm0, %v431_v19 }
 0x1dd   :  { %v434_v21 = vpop.xlane.xlu1 %433  ;;  %v443_v36 = vpop.xlane.xlu0 %442 }
 0x1de   :  { %451 = vst.msk [vmem:[%s796_s3 + $0x18] sm:$0xff] %vm447_vm0, %v434_v21  ;;  %454 = vst.msk [vmem:[%s796_s3 + $0x30] sm:$0xff] %vm447_vm0, %v443_v36 }
 0x1e1   :  { %v446_v50 = vpop.xlane.xlu1 %445 }
 0x1e2   :  { %455 = vst.msk [vmem:[%s796_s3 + $0x38] sm:$0xff] %vm447_vm0, %v446_v50 }
 0x1e3   :  { %460 = vsyncpa [#allocation3], 1 }
 0x1e4   :  { %461 = vsyncpa [#allocation5], 1 }

</bundles_post_ra>
